<compile_context>
chip_gen: v6e
topology: v6e:2x2x1
jax: 0.10.0
libtpu: 0.0.40
codegen_flags: <defaults>
</compile_context>

<pallas_src>
import functools

import jax
import jax.numpy as jnp
from jax import lax
from jax.experimental import pallas as pl
from jax.experimental.pallas import tpu as pltpu


def _round_up(x, m):
    return ((x + m - 1) // m) * m


# ----------------------------------------------------------------------------
# Pallas kernels
# ----------------------------------------------------------------------------
def _qk_proj_kernel(tok_ref, wq_ref, bq_ref, wkt_ref, qk_ref, *, scale):
    """q_k = ((tokens @ Wq + bq) * scale) @ Wk^T  over the flattened (B*T, C)
    token stream (bk dropped: a per-row score constant cancels in softmax)."""
    q = jnp.dot(tok_ref[...], wq_ref[...],
                preferred_element_type=jnp.float32)                  # (M, C) f32
    q = (q + bq_ref[...]) * scale
    qk_ref[...] = jnp.dot(q.astype(jnp.bfloat16), wkt_ref[...],
                          preferred_element_type=jnp.float32).astype(qk_ref.dtype)


def _flash_xattn_kernel(qk_ref, src_ref, pos_ref, dense_ref, pv_ref,
                        m_sc, l_sc, acc_sc):
    """Flash-style cross-attention over an HW tile:
       X_v = src + dense, X_k = X_v + pos, s = q_k . X_k^T, online softmax,
       accumulate p @ X_v. Output pv = softmax(s) @ X_v (normalized at end)."""
    j = pl.program_id(1)

    @pl.when(j == 0)
    def _():
        m_sc[...] = jnp.full(m_sc.shape, -jnp.inf, jnp.float32)
        l_sc[...] = jnp.zeros(l_sc.shape, jnp.float32)
        acc_sc[...] = jnp.zeros(acc_sc.shape, jnp.float32)

    xv = src_ref[0] + dense_ref[0]                                   # (tile, C) bf16
    xk = xv + pos_ref[0]                                             # (tile, C) bf16

    # scores: contract last dims (no K transpose / relayout); scale already in q_k
    s = lax.dot_general(qk_ref[0], xk,
                        dimension_numbers=(((1,), (1,)), ((), ())),
                        preferred_element_type=jnp.float32)          # (T, tile) f32

    m_new = jnp.maximum(m_sc[...], jnp.max(s, axis=-1, keepdims=True))
    a = jnp.exp(m_sc[...] - m_new)
    p = jnp.exp(s - m_new)
    l_sc[...] = a * l_sc[...] + jnp.sum(p, axis=-1, keepdims=True)
    acc_sc[...] = a * acc_sc[...] + jnp.dot(p.astype(jnp.bfloat16), xv,
                                            preferred_element_type=jnp.float32)
    m_sc[...] = m_new

    @pl.when(j == pl.num_programs(1) - 1)
    def _():
        pv_ref[0] = (acc_sc[...] * pl.reciprocal(l_sc[...], approx=True)
                     ).astype(pv_ref.dtype)


def _epilogue_kernel(tok_ref, pv_ref, wv_ref, bv_ref, wo_ref, bo_ref, hs_ref):
    """hs = tokens + ((pv @ Wv + bv) @ Wo + bo) over the flattened token stream
    (bv is exact post-softmax since attention rows sum to ~1)."""
    o = jnp.dot(pv_ref[...], wv_ref[...],
                preferred_element_type=jnp.float32) + bv_ref[...]
    o = jnp.dot(o.astype(jnp.bfloat16), wo_ref[...],
                preferred_element_type=jnp.float32) + bo_ref[...]
    hs_ref[...] = (tok_ref[...].astype(jnp.float32) + o).astype(hs_ref.dtype)


def _mlp3_fused_kernel(x_ref, w1_ref, b1_ref, w2_ref, b2_ref, w3_ref, b3_ref,
                       out_ref):
    """One class-token MLP head per grid step: relu(relu(x W1+b1) W2+b2) W3+b3."""
    x = x_ref[0]                                                     # (Bp, C) bf16
    h = jnp.dot(x, w1_ref[0], preferred_element_type=jnp.float32) + b1_ref[0]
    h = jnp.maximum(h, 0.0).astype(jnp.bfloat16)
    h = jnp.dot(h, w2_ref[0], preferred_element_type=jnp.float32) + b2_ref[0]
    h = jnp.maximum(h, 0.0).astype(jnp.bfloat16)
    y = jnp.dot(h, w3_ref[0], preferred_element_type=jnp.float32) + b3_ref[0]
    out_ref[0] = y.astype(out_ref.dtype)                             # (Bp, OPAD)


# ----------------------------------------------------------------------------
# Wrappers calling pallas_call
# ----------------------------------------------------------------------------
def token_qk_projection(tokens_flat, wq, bq, wk_t, *, scale):
    """tokens_flat: (B*T_pad, C) bf16 -> q_k (B*T_pad, C) bf16."""
    M, C = tokens_flat.shape
    full = lambda shp: pl.BlockSpec(shp, lambda i: (0, 0))
    return pl.pallas_call(
        functools.partial(_qk_proj_kernel, scale=scale),
        out_shape=jax.ShapeDtypeStruct((M, C), jnp.bfloat16),
        grid=(1,),
        in_specs=[full((M, C)), full((C, C)), full((1, C)), full((C, C))],
        out_specs=full((M, C)),
    )(tokens_flat, wq, bq, wk_t)


def flash_cross_attention(q_k, src_t, pos_t, dense_t, *, tile_hw):
    """q_k: (B, T, C) bf16; src_t: (Bi, HW, C); pos_t: (1, HW, C);
       dense_t: (B, HW, C) -> pv (B, T, C) bf16 = softmax(q_k.X_k^T) @ X_v."""
    B, T, C = q_k.shape
    Bi, HW, _ = src_t.shape
    if HW % tile_hw != 0 or tile_hw % 8 != 0:
        tile_hw = HW
    n_hw = HW // tile_hw

    qk_spec = pl.BlockSpec((1, T, C), lambda b, j: (b, 0, 0))
    if Bi == B:
        src_spec = pl.BlockSpec((1, tile_hw, C), lambda b, j: (b, j, 0))
    else:  # Bi == 1: broadcast via index_map, no HBM duplication
        src_spec = pl.BlockSpec((1, tile_hw, C), lambda b, j: (0, j, 0))
    pos_spec = pl.BlockSpec((1, tile_hw, C), lambda b, j: (0, j, 0))
    dense_spec = pl.BlockSpec((1, tile_hw, C), lambda b, j: (b, j, 0))

    return pl.pallas_call(
        _flash_xattn_kernel,
        out_shape=jax.ShapeDtypeStruct((B, T, C), jnp.bfloat16),
        grid=(B, n_hw),
        in_specs=[qk_spec, src_spec, pos_spec, dense_spec],
        out_specs=qk_spec,
        scratch_shapes=[pltpu.VMEM((T, 1), jnp.float32),   # running max
                        pltpu.VMEM((T, 1), jnp.float32),   # running sum
                        pltpu.VMEM((T, C), jnp.float32)],  # accumulator
        compiler_params=pltpu.CompilerParams(
            dimension_semantics=("parallel", "arbitrary"),
            vmem_limit_bytes=32 * 1024 * 1024),
    )(q_k, src_t, pos_t, dense_t)


def attention_epilogue(tokens_flat, pv_flat, wv, bv, wo, bo):
    """tokens_flat, pv_flat: (B*T_pad, C) bf16 -> hs (B*T_pad, C) bf16."""
    M, C = tokens_flat.shape
    full = lambda shp: pl.BlockSpec(shp, lambda i: (0, 0))
    return pl.pallas_call(
        _epilogue_kernel,
        out_shape=jax.ShapeDtypeStruct((M, C), jnp.bfloat16),
        grid=(1,),
        in_specs=[full((M, C)), full((M, C)), full((C, C)), full((1, C)),
                  full((C, C)), full((1, C))],
        out_specs=full((M, C)),
    )(tokens_flat, pv_flat, wv, bv, wo, bo)


def fused_mlp_heads(x, w1s, b1s, w2s, b2s, w3s, b3s):
    """x: (Ncls, B_pad, C) bf16; stacked per-head weights; -> (Ncls, B_pad, OPAD) f32."""
    N, Bp, C = x.shape
    OPAD = w3s.shape[-1]
    xi = pl.BlockSpec((1, Bp, C), lambda i: (i, 0, 0))
    wm = pl.BlockSpec((1, C, C), lambda i: (i, 0, 0))
    vb = pl.BlockSpec((1, 1, C), lambda i: (i, 0, 0))
    w3 = pl.BlockSpec((1, C, OPAD), lambda i: (i, 0, 0))
    b3 = pl.BlockSpec((1, 1, OPAD), lambda i: (i, 0, 0))
    out = pl.BlockSpec((1, Bp, OPAD), lambda i: (i, 0, 0))
    return pl.pallas_call(
        _mlp3_fused_kernel,
        out_shape=jax.ShapeDtypeStruct((N, Bp, OPAD), jnp.float32),
        grid=(N,),
        in_specs=[xi, wm, vb, wm, vb, w3, b3],
        out_specs=out,
        compiler_params=pltpu.CompilerParams(
            dimension_semantics=("parallel",)),
    )(x, w1s, b1s, w2s, b2s, w3s, b3s)


# ----------------------------------------------------------------------------
# ClassDecoder forward (JAX glue around the Pallas kernels)
# ----------------------------------------------------------------------------
def class_decoder_forward(params, image_embeddings, image_pe,
                          sparse_prompt_embeddings, dense_prompt_embeddings,
                          *, num_cls_tokens, cls_output_dims, tile_hw=512):
    """Inputs follow the PyTorch module:
         image_embeddings:        (Bi, C, H, W)   (Bi == 1 or Bi == B)
         image_pe:                (1,  C, H, W)
         sparse_prompt_embeddings:(B,  Ns, C)
         dense_prompt_embeddings: (B,  C, H, W)
       Returns list of (B, cls_output_dims[i]) arrays.
    """
    B = sparse_prompt_embeddings.shape[0]
    C = params["cls_tokens"].shape[1]
    Bi = image_embeddings.shape[0]
    if Bi not in (1, B):
        raise ValueError(f"image_embeddings batch {Bi} must be 1 or {B}")
    if image_pe.shape[0] != 1:
        raise ValueError("image_pe is expected to have batch dim 1")

    # tokens = cat(cls_tokens expanded to batch, sparse prompts), padded to a
    # sublane-dense token count (multiple of 16 for bf16 MXU operands).
    cls_tok = jnp.broadcast_to(params["cls_tokens"][None].astype(jnp.bfloat16),
                               (B, num_cls_tokens, C))
    tokens = jnp.concatenate(
        [cls_tok, sparse_prompt_embeddings.astype(jnp.bfloat16)], axis=1)
    T = tokens.shape[1]
    T_pad = _round_up(T, 16)
    if T_pad != T:
        tokens = jnp.pad(tokens, ((0, 0), (0, T_pad - T), (0, 0)))

    # NCHW -> (batch, HW, C) channel-last token form (no batch duplication).
    def nchw_to_seq(x):
        b, c, h, w = x.shape
        return jnp.transpose(x, (0, 2, 3, 1)).reshape(b, h * w, c)

    src_t = nchw_to_seq(image_embeddings).astype(jnp.bfloat16)       # (Bi, HW, C)
    pos_t = nchw_to_seq(image_pe).astype(jnp.bfloat16)               # (1,  HW, C)
    dense_t = nchw_to_seq(dense_prompt_embeddings).astype(jnp.bfloat16)  # (B, HW, C)

    p = params["transformer"]
    scale = 1.0 / float(C) ** 0.5
    wk_t = jnp.transpose(p["wk"])                                     # (C, C) bf16

    # Stage A: token-side pre-projection (M = B*T_pad, fixes MXU M-underuse).
    tokens_flat = tokens.reshape(B * T_pad, C)
    q_k = token_qk_projection(tokens_flat, p["wq"], p["bq"], wk_t, scale=scale)
    q_k = q_k.reshape(B, T_pad, C)

    # Stage B: flash cross-attention over HW tiles (no K/V stream projection).
    pv = flash_cross_attention(q_k, src_t, pos_t, dense_t, tile_hw=tile_hw)

    # Stage C: residual Wv/Wo epilogue on the flattened token stream.
    hs_flat = attention_epilogue(tokens_flat, pv.reshape(B * T_pad, C),
                                 p["wv"], p["bv"], p["wo"], p["bo"])
    hs = hs_flat.reshape(B, T_pad, C)                                 # bf16

    # Stage D: all class-token MLP heads fused into one pallas_call.
    ncls = num_cls_tokens
    x = jnp.transpose(hs[:, :ncls, :], (1, 0, 2))                     # (ncls, B, C)
    B_pad = _round_up(B, 16)          # sublane-dense M for bf16 operands
    if B_pad != B:
        x = jnp.pad(x, ((0, 0), (0, B_pad - B), (0, 0)))

    OPAD = _round_up(max(cls_output_dims), 128)                       # lane-dense out
    mlps = params["mlps"]
    w1s = jnp.stack([m["w1"] for m in mlps])                          # (ncls, C, C)
    b1s = jnp.stack([m["b1"] for m in mlps])                          # (ncls, 1, C)
    w2s = jnp.stack([m["w2"] for m in mlps])
    b2s = jnp.stack([m["b2"] for m in mlps])
    w3s = jnp.stack([jnp.pad(m["w3"], ((0, 0), (0, OPAD - m["w3"].shape[1])))
                     for m in mlps])                                  # (ncls, C, OPAD)
    b3s = jnp.stack([jnp.pad(m["b3"], ((0, 0), (0, OPAD - m["b3"].shape[1])))
                     for m in mlps])                                  # (ncls, 1, OPAD)

    out = fused_mlp_heads(x, w1s, b1s, w2s, b2s, w3s, b3s)            # (ncls, Bp, OPAD)
    return [out[i, :B, :cls_output_dims[i]] for i in range(ncls)]


# ----------------------------------------------------------------------------
# Deterministic parameter init + pure-JAX reference
# ----------------------------------------------------------------------------
def init_params(key, transformer_dim, num_cls_tokens, cls_output_dims):
    C = transformer_dim
    keys = jax.random.split(key, 10)
    s = 0.05

    def w(k, shp, dtype=jnp.bfloat16):
        return (s * jax.random.normal(k, shp, jnp.float32)).astype(dtype)

    transformer = {
        "wq": w(keys[0], (C, C)), "bq": w(keys[1], (1, C), jnp.float32),
        "wk": w(keys[2], (C, C)), "bk": w(keys[3], (1, C), jnp.float32),
        "wv": w(keys[4], (C, C)), "bv": w(keys[5], (1, C), jnp.float32),
        "wo": w(keys[6], (C, C)), "bo": w(keys[7], (1, C), jnp.float32),
    }
    mlps = []
    mk = jax.random.split(keys[8], num_cls_tokens)
    for i in range(num_cls_tokens):
        ks = jax.random.split(mk[i], 6)
        d_out = cls_output_dims[i]
        mlps.append({
            "w1": w(ks[0], (C, C)),     "b1": w(ks[1], (1, C), jnp.float32),
            "w2": w(ks[2], (C, C)),     "b2": w(ks[3], (1, C), jnp.float32),
            "w3": w(ks[4], (C, d_out)), "b3": w(ks[5], (1, d_out), jnp.float32),
        })
    return {
        "cls_tokens": w(keys[9], (num_cls_tokens, C)),   # bf16
        "transformer": transformer,
        "mlps": mlps,
    }


def _reference_forward(params, image_embeddings, image_pe, sparse, dense,
                       *, num_cls_tokens, cls_output_dims):
    """Pure-JAX f32 reference of the same computation (un-reassociated form),
    consuming the same bf16-rounded parameters / inputs the kernels see."""
    f32 = lambda a: a.astype(jnp.float32)
    bf = lambda a: a.astype(jnp.bfloat16).astype(jnp.float32)

    B = sparse.shape[0]
    C = params["cls_tokens"].shape[1]
    out_tok = jnp.broadcast_to(f32(params["cls_tokens"])[None],
                               (B, num_cls_tokens, C))
    tokens = jnp.concatenate([out_tok, bf(sparse)], axis=1)

    src = bf(image_embeddings)
    if src.shape[0] != B:
        src = jnp.broadcast_to(src, (B,) + src.shape[1:])
    pos = jnp.broadcast_to(bf(image_pe), (B,) + image_pe.shape[1:])
    dense_b = bf(dense)

    def n2t(x):
        b, c, h, w = x.shape
        return jnp.transpose(x, (0, 2, 3, 1)).reshape(b, h * w, c)

    src_t, pos_t, dense_t = n2t(src), n2t(pos), n2t(dense_b)
    p = {k: f32(v) for k, v in params["transformer"].items()}
    kv = src_t + dense_t
    q = tokens @ p["wq"] + p["bq"]
    k = (kv + pos_t) @ p["wk"] + p["bk"]
    v = kv @ p["wv"] + p["bv"]
    s = jnp.einsum("btc,bkc->btk", q, k) / jnp.sqrt(jnp.float32(C))
    a = jax.nn.softmax(s, axis=-1)
    hs = tokens + jnp.einsum("btk,bkc->btc", a, v) @ p["wo"] + p["bo"]
    outs = []
    for i in range(num_cls_tokens):
        mp = {kk: f32(vv) for kk, vv in params["mlps"][i].items()}
        x = hs[:, i, :]
        x = jax.nn.relu(x @ mp["w1"] + mp["b1"])
        x = jax.nn.relu(x @ mp["w2"] + mp["b2"])
        outs.append(x @ mp["w3"] + mp["b3"])
    return outs


if __name__ == "__main__":
    # Small shapes consistent with the module interface.
    B = 2                    # prompt batch
    C = 32                   # transformer_dim
    H = W = 8                # image embedding spatial size
    NS = 4                   # number of sparse prompt tokens
    NUM_CLS_TOKENS = 1
    CLS_OUTPUT_DIMS = [2]
    TILE_HW = 32             # forces 2 flash HW tiles at HW=64 (exercises online softmax)

    key = jax.random.PRNGKey(0)
    k_img, k_pe, k_sparse, k_dense, k_par = jax.random.split(key, 5)

    image_embeddings = jax.random.normal(k_img, (1, C, H, W), jnp.float32)
    image_pe = jax.random.normal(k_pe, (1, C, H, W), jnp.float32)
    sparse_prompt_embeddings = jax.random.normal(k_sparse, (B, NS, C), jnp.float32)
    dense_prompt_embeddings = jax.random.normal(k_dense, (B, C, H, W), jnp.float32)

    params = init_params(k_par, C, NUM_CLS_TOKENS, CLS_OUTPUT_DIMS)

    outs = class_decoder_forward(
        params, image_embeddings, image_pe,
        sparse_prompt_embeddings, dense_prompt_embeddings,
        num_cls_tokens=NUM_CLS_TOKENS, cls_output_dims=CLS_OUTPUT_DIMS,
        tile_hw=TILE_HW)
    outs = [jax.block_until_ready(o) for o in outs]

    refs = _reference_forward(
        params, image_embeddings, image_pe,
        sparse_prompt_embeddings, dense_prompt_embeddings,
        num_cls_tokens=NUM_CLS_TOKENS, cls_output_dims=CLS_OUTPUT_DIMS)
    for o, r in zip(outs, refs):
        assert o.shape == r.shape, (o.shape, r.shape)
        err = float(jnp.max(jnp.abs(o - r)))
        assert err < 3e-3, f"max abs err {err}"

    print("KERNEL_OK")
</pallas_src>

<mosaic_0001>
module attributes {stable_mosaic.version = 11 : i64} {
  func.func @_qk_proj_kernel(%arg0: i32, %arg1: memref<32x32xbf16, #tpu.memory_space<vmem>>, %arg2: memref<32x32xbf16, #tpu.memory_space<vmem>>, %arg3: memref<1x32xf32, #tpu.memory_space<vmem>>, %arg4: memref<32x32xbf16, #tpu.memory_space<vmem>>, %arg5: memref<32x32xbf16, #tpu.memory_space<vmem>>) attributes {dimension_semantics = [#tpu.dimension_semantics<arbitrary>], iteration_bounds = array<i64: 1>, scalar_prefetch = 0 : i64, scratch_operands = 0 : i64, tpu.core_type = #tpu.core_type<tc>, window_params = [{pipeline_mode = #tpu.pipeline_mode<synchronous>, transform_indices = @transform_0, window_bounds = array<i64: 32, 32>}, {pipeline_mode = #tpu.pipeline_mode<synchronous>, transform_indices = @transform_1, window_bounds = array<i64: 32, 32>}, {pipeline_mode = #tpu.pipeline_mode<synchronous>, transform_indices = @transform_2, window_bounds = array<i64: 1, 32>}, {pipeline_mode = #tpu.pipeline_mode<synchronous>, transform_indices = @transform_3, window_bounds = array<i64: 32, 32>}, {pipeline_mode = #tpu.pipeline_mode<synchronous>, transform_indices = @transform_4, window_bounds = array<i64: 32, 32>}]} {
    %c0 = arith.constant 0 : index
    %c0_0 = arith.constant 0 : index
    %0 = vector.load %arg1[%c0, %c0_0] : memref<32x32xbf16, #tpu.memory_space<vmem>>, vector<32x32xbf16>
    %c0_1 = arith.constant 0 : index
    %c0_2 = arith.constant 0 : index
    %1 = vector.load %arg2[%c0_1, %c0_2] : memref<32x32xbf16, #tpu.memory_space<vmem>>, vector<32x32xbf16>
    %cst = arith.constant dense<0.000000e+00> : vector<32x32xf32>
    %2 = tpu.matmul %0, %1, %cst {dimension_numbers = #tpu.dot_dimension_numbers<[1], [0], [0], [1], [0, 0, 1, 1], [], []>} : vector<32x32xbf16>, vector<32x32xbf16>, vector<32x32xf32> -> vector<32x32xf32>
    %c0_3 = arith.constant 0 : index
    %c0_4 = arith.constant 0 : index
    %3 = vector.load %arg3[%c0_3, %c0_4] : memref<1x32xf32, #tpu.memory_space<vmem>>, vector<1x32xf32>
    %4 = vector.broadcast %3 : vector<1x32xf32> to vector<32x32xf32>
    %5 = arith.addf %2, %4 : vector<32x32xf32>
    %cst_5 = arith.constant 0.176776692 : f32
    %6 = vector.broadcast %cst_5 : f32 to vector<32x32xf32>
    %7 = arith.mulf %5, %6 : vector<32x32xf32>
    %8 = arith.truncf %7 : vector<32x32xf32> to vector<32x32xbf16>
    %c0_6 = arith.constant 0 : index
    %c0_7 = arith.constant 0 : index
    %9 = vector.load %arg4[%c0_6, %c0_7] : memref<32x32xbf16, #tpu.memory_space<vmem>>, vector<32x32xbf16>
    %cst_8 = arith.constant dense<0.000000e+00> : vector<32x32xf32>
    %10 = tpu.matmul %8, %9, %cst_8 {dimension_numbers = #tpu.dot_dimension_numbers<[1], [0], [0], [1], [0, 0, 1, 1], [], []>} : vector<32x32xbf16>, vector<32x32xbf16>, vector<32x32xf32> -> vector<32x32xf32>
    %11 = arith.truncf %10 : vector<32x32xf32> to vector<32x32xbf16>
    %c0_9 = arith.constant 0 : index
    %c0_10 = arith.constant 0 : index
    %12 = vector.load %arg5[%c0_9, %c0_10] : memref<32x32xbf16, #tpu.memory_space<vmem>>, vector<32x32xbf16>
    tpu.vector_store %arg5[%c0_9, %c0_10], %11 {strides = array<i32>} : memref<32x32xbf16, #tpu.memory_space<vmem>>, vector<32x32xbf16>,
    return
  }
  func.func @transform_0(%arg0: i32) -> (i32, i32) {
    %c0_i32 = arith.constant 0 : i32
    %c0_i32_0 = arith.constant 0 : i32
    %c0_i32_1 = arith.constant 0 : i32
    return %c0_i32, %c0_i32_0 : i32, i32
  }
  func.func @transform_1(%arg0: i32) -> (i32, i32) {
    %c0_i32 = arith.constant 0 : i32
    %c0_i32_0 = arith.constant 0 : i32
    %c0_i32_1 = arith.constant 0 : i32
    return %c0_i32, %c0_i32_0 : i32, i32
  }
  func.func @transform_2(%arg0: i32) -> (i32, i32) {
    %c0_i32 = arith.constant 0 : i32
    %c0_i32_0 = arith.constant 0 : i32
    %c0_i32_1 = arith.constant 0 : i32
    return %c0_i32, %c0_i32_0 : i32, i32
  }
  func.func @transform_3(%arg0: i32) -> (i32, i32) {
    %c0_i32 = arith.constant 0 : i32
    %c0_i32_0 = arith.constant 0 : i32
    %c0_i32_1 = arith.constant 0 : i32
    return %c0_i32, %c0_i32_0 : i32, i32
  }
  func.func @transform_4(%arg0: i32) -> (i32, i32) {
    %c0_i32 = arith.constant 0 : i32
    %c0_i32_0 = arith.constant 0 : i32
    %c0_i32_1 = arith.constant 0 : i32
    return %c0_i32, %c0_i32_0 : i32, i32
  }
}

</mosaic_0001>

<bundles_post_ra>
// kernel: tpu_custom_call.1
= control target key start
LH: loop header
LB: loop body
LE: loop exit
PB: predicated region body
PF: predicated region fallthrough
CT: control target
= control target key end

     0   :  { %9 = vsyncpa [#allocation3], 0  ;;  %s472_s0 = inlined_call_operand.hbm [shape: bf16[32,32], index: 0, kind: input, shape index: {}]   ;;  %s473_s1 = inlined_call_operand.hbm [shape: bf16[32,32], index: 1, kind: input, shape index: {}]   ;;  %s474_s2 = inlined_call_operand.vmem [shape: f32[1,32], index: 2, kind: input, shape index: {}]   ;;  %s475_s3 = inlined_call_operand.hbm [shape: bf16[32,32], index: 3, kind: input, shape index: {}]   ;;  %s476_s4 = inlined_call_operand.hbm [shape: bf16[32,32], index: 4, kind: output, shape index: {}]  }
   0x1   :  { %10 = vsyncpa [#allocation6], 0 }
   0x2   :  { %11 = vsyncpa [#allocation4], 0  ;;  %s410_s15 = smov [#allocation5]   ;;  %s411_s17 = smov [#allocation2]  }
   0x3   :  { %s29_s16 = sshll.u32 %s410_s15, 4  ;;  %s17_s18 = sshll.u32 %s411_s17, 4  ;;  %s30_s16 = int_to_ptr.vmem [resolvable:$true] %s29_s16  ;;  %s18_s18 = int_to_ptr.vmem [resolvable:$true] %s17_s18 }
   0x4   :  { %s332_s19 = scalar_lea.vmem %s30_s16, 256  ;;  %p337_p1 = scmp.lt.s32.totalorder %s30_s16, %s30_s16 }
   0x5   :  { %p333_p0 = scmp.ne.s32.totalorder %s30_s16, %s332_s19  ;;  %p338_p2 = scmp.lt.s32.totalorder %s332_s19, %s332_s19 }
   0x7   :  { %p339_p3 = por %p338_p2, %p337_p1 }
   0x9   :  { %p340_p4 = pnand %p339_p3, %p333_p0 }
   0xb   :  { %343 = shalt.err (!%p340_p4)
}
   0xc   :  { %s412_s20 = smov 64   ;;  %s413_s21 = smov 4  }
   0xd   :  { %35 = dma.hbm_to_vmem [thread:$0]  %s473_s1, 256, %s30_s16, [#allocation6], %s412_s20, %s412_s20, %s413_s21  }
   0xe   :  { %s352_s24 = scalar_lea.vmem %s18_s18, 256  ;;  %p357_p6 = scmp.lt.s32.totalorder %s18_s18, %s18_s18 }
   0xf   :  { %p353_p5 = scmp.ne.s32.totalorder %s18_s18, %s352_s24  ;;  %p358_p7 = scmp.lt.s32.totalorder %s352_s24, %s352_s24 }
  0x11   :  { %p359_p8 = por %p358_p7, %p357_p6 }
  0x13   :  { %p360_p9 = pnand %p359_p8, %p353_p5 }
  0x15   :  { %363 = shalt.err (!%p360_p9)
}
  0x16   :  { %23 = dma.hbm_to_vmem [thread:$0]  %s472_s0, 256, %s18_s18, [#allocation3], %s412_s20, %s412_s20, %s413_s21  }
  0x17   :  { %s414_s27 = smov [#allocation7]  }
  0x18   :  { %s43_s28 = sshll.u32 %s414_s27, 4  ;;  %s44_s28 = int_to_ptr.vmem [resolvable:$true] %s43_s28 }
  0x19   :  { %s372_s29 = scalar_lea.vmem %s44_s28, 256  ;;  %p377_p11 = scmp.lt.s32.totalorder %s44_s28, %s44_s28 }
  0x1a   :  { %p373_p10 = scmp.ne.s32.totalorder %s44_s28, %s372_s29  ;;  %p378_p12 = scmp.lt.s32.totalorder %s372_s29, %s372_s29 }
  0x1c   :  { %p379_p13 = por %p378_p12, %p377_p11 }
  0x1e   :  { %p380_p0 = pnand %p379_p13, %p373_p10 }
  0x20   :  { %383 = shalt.err (!%p380_p0)
}
  0x21   :  { %49 = dma.hbm_to_vmem [thread:$0]  %s475_s3, 256, %s44_s28, [#allocation6], %s412_s20, %s412_s20, %s413_s21  }
  0x22   :  { %404 = dma.done.wait [#allocation3], 256  }
  0x23   :  { %405 = vsyncadd [#allocation3], 4294967040 }
  0x24   :  { %406 = dma.done.wait [#allocation6], 512  }
  0x25   :  { %407 = vsyncadd [#allocation6], 4294966784  ;;  %v318_v0 = vld [vmem:[#allocation5 + $0x8] sm:$0xff]   ;;  %v319_v1 = vld [vmem:[#allocation5] sm:$0xff]   ;;  %vm97_vm0 = vcmask 261120   ;;  %vm246_vm1 = vcmask 257024  }
  0x26   :  { %296 = vmatprep.subr.bf16.mxu0 %v318_v0  ;;  %v320_v2 = vld [vmem:[#allocation2] sm:$0xff]   ;;  %v321_v3 = vld [vmem:[#allocation2 + $0x8] sm:$0xff]  }
  0x27   :  { %297 = vmatpush3.bf16.msra.mxu0 %v318_v0  ;;  %300 = vmatprep.mubr.msk.bf16.mxu0 %vm97_vm0, %v320_v2  ;;  %v322_v4 = vld [vmem:[#allocation7 + $0x8] sm:$0xff]   ;;  %v323_v5 = vld [vmem:[#allocation7] sm:$0xff]  }
  0x28   :  { %298 = vmatprep.subr.bf16.mxu0 %v319_v1  ;;  %304 = vmatprep.subr.bf16.mxu1 %v322_v4  ;;  %v269_v8 = vld [vmem:[%s474_s2] ss:$0 sm:$0xff]  ;;  %s415_s2 = smov [#allocation8]  }
  0x29   :  { %305 = vmatpush3.bf16.msra.mxu1 %v322_v4  ;;  %s256_s5 = sshll.u32 %s415_s2, 4  ;;  %s257_s5 = int_to_ptr.vmem [resolvable:$true] %s256_s5 }
  0x2a   :  { %306 = vmatprep.subr.bf16.mxu1 %v323_v5  ;;  %s384_s6 = scalar_lea.vmem %s257_s5, 256  ;;  %p389_p2 = scmp.lt.s32.totalorder %s257_s5, %s257_s5 }
  0x2b   :  { %299 = vmatpush3.bf16.msra.mxu0 %v319_v1  ;;  %p385_p1 = scmp.ne.s32.totalorder %s257_s5, %s384_s6  ;;  %p390_p3 = scmp.lt.s32.totalorder %s384_s6, %s384_s6 }
  0x2d   :  { %307 = vmatpush3.bf16.msra.mxu1 %v323_v5  ;;  %p391_p4 = por %p390_p3, %p389_p2 }
  0x2e   :  { %301 = vmatmul.mubr.msk.bf16.vlgmr.msra.gmra.mxu0 %vm97_vm0, %v321_v3 }
  0x2f   :  { %p392_p5 = pnand %p391_p4, %p385_p1 }
  0xee   :  { %v302_v6 = vpop.f32.mrf.mxu0 }
  0xef   :  { %v147_v12 = vadd.f32 %v302_v6, %v269_v8 }
  0xf0   :  { %v138_v7 = vpop.f32.mrf.mxu0 }
  0xf1   :  { %v139_v10 = vadd.f32 %v269_v8, %v138_v7  ;;  %v155_v18 = vmul.f32 0.17677669, %v147_v12 }
  0xf2   :  { %v303_v9 = vpop.f32.mrf.mxu0 }
  0xf3   :  { %v150_v11 = vadd.f32 %v303_v9, %v269_v8  ;;  %v153_v16 = vmul.f32 0.17677669, %v139_v10 }
  0xf4   :  { %v141_v13 = vpop.f32.mrf.mxu0 }
  0xf5   :  { %v142_v14 = vadd.f32 %v269_v8, %v141_v13  ;;  %v156_v15 = vmul.f32 0.17677669, %v150_v11 }
  0xf7   :  { %v154_v17 = vmul.f32 0.17677669, %v142_v14  ;;  %v158_v20 = vpack.c.bf16 %v156_v15, %v155_v18 }
  0xf9   :  { %v157_v19 = vpack.c.bf16 %v154_v17, %v153_v16 }
  0xfb   :  { %308 = vmatprep.mubr.msk.bf16.mxu1 %vm97_vm0, %v157_v19 }
  0xfc   :  { %309 = vmatmul.mubr.msk.bf16.vlgmr.msra.gmra.mxu1 %vm97_vm0, %v158_v20 }
 0x1bc   :  { %v310_v21 = vpop.f32.mrf.mxu1 }
 0x1bd   :  { %v286_v22 = vpack.c.bf16 %v310_v21, %v310_v21 }
 0x1be   :  { %v215_v23 = vpop.f32.mrf.mxu1 }
 0x1bf   :  { %249 = vst.msk [vmem:[#allocation8 + $0x8] sm:$0xf] %vm246_vm1, %v286_v22  ;;  %v284_v24 = vpack.c.bf16 %v215_v23, %v215_v23 }
 0x1c0   :  { %v311_v25 = vpop.f32.mrf.mxu1 }
 0x1c1   :  { %247 = vst.msk [vmem:[#allocation8] sm:$0xf] %vm246_vm1, %v284_v24  ;;  %v287_v26 = vpack.c.bf16 %v311_v25, %v311_v25 }
 0x1c2   :  { %v218_v27 = vpop.f32.mrf.mxu1 }
 0x1c3   :  { %250 = vst.msk [vmem:[#allocation8 + $0xc] sm:$0xf] %vm246_vm1, %v287_v26  ;;  %v285_v28 = vpack.c.bf16 %v218_v27, %v218_v27 }
 0x1c5   :  { %248 = vst.msk [vmem:[#allocation8 + $0x4] sm:$0xf] %vm246_vm1, %v285_v28 }
 0x1c6   :  { %395 = shalt.err (!%p392_p5)
}
 0x1c7   :  { %262 = dma.vmem_to_hbm [thread:$0]  %s257_s5, 256, %s476_s4, [#allocation4], %s412_s20, %s412_s20, %s413_s21  }
 0x1c8   :  { %408 = dma.done.wait [#allocation4], 256  }
 0x1c9   :  { %409 = vsyncadd [#allocation4], 4294967040 }
 0x1ca   :  { %266 = vsyncpa [#allocation3], 1 }
 0x1cb   :  { %267 = vsyncpa [#allocation6], 1 }
 0x1cc   :  { %268 = vsyncpa [#allocation4], 1 }

</bundles_post_ra>
